<compile_context>
chip_gen: v7x
topology: tpu7x:2x2x1
jax: 0.10.0
libtpu: 0.0.40
codegen_flags: <defaults>
</compile_context>

<pallas_src>
import functools

import jax
import jax.numpy as jnp
from jax.experimental import pallas as pl
from jax.experimental.pallas import tpu as pltpu


def mlp3_kernel(x_ref, w1_ref, b1_ref, w2_ref, b2_ref, w3_ref, b3_ref, o_ref,
                *, matmul_dtype=None):
    x = x_ref[...]
    w1 = w1_ref[...]
    w2 = w2_ref[...]
    w3 = w3_ref[...]
    if matmul_dtype is not None:
        # Cast matmul operands only; bias add / ReLU / accumulation stay f32
        # (v5e has no bf16 VPU datapath, MXU takes bf16 inputs on all gens).
        x, w1, w2, w3 = (t.astype(matmul_dtype) for t in (x, w1, w2, w3))

    # layer 1: Linear + clamp(min=0) == ReLU
    h1 = jnp.dot(x, w1, preferred_element_type=jnp.float32) + b1_ref[...]
    h1 = jnp.maximum(h1, 0.0)
    if matmul_dtype is not None:
        h1 = h1.astype(matmul_dtype)

    # layer 2: Linear + ReLU
    h2 = jnp.dot(h1, w2, preferred_element_type=jnp.float32) + b2_ref[...]
    h2 = jnp.maximum(h2, 0.0)
    if matmul_dtype is not None:
        h2 = h2.astype(matmul_dtype)

    # layer 3: Linear (no activation)
    y = jnp.dot(h2, w3, preferred_element_type=jnp.float32) + b3_ref[...]
    o_ref[...] = y.astype(o_ref.dtype)


def three_layer_net(x, w1, b1, w2, b2, w3, b3, *, tile_b=512, matmul_dtype=None):
    """x: (B, D_in), w_i: (in, out), b_i: (1, out). Returns (B, D_out)."""
    B, D_in = x.shape
    D_out = w3.shape[1]

    # Biggest batch tile that makes sense: cap at `tile_b`, keep it a multiple
    # of 8 (f32 sublane) unless it covers the whole batch.
    tb = min(tile_b, B)
    if tb != B:
        tb = max(8, (tb // 8) * 8)

    grid = (pl.cdiv(B, tb),)

    batch_spec = lambda d: pl.BlockSpec((tb, d), lambda i: (i, 0))
    # Weights / biases: same block every grid step -> resident in VMEM.
    resident = lambda shape: pl.BlockSpec(shape, lambda i: (0, 0))

    kernel = functools.partial(mlp3_kernel, matmul_dtype=matmul_dtype)

    return pl.pallas_call(
        kernel,
        out_shape=jax.ShapeDtypeStruct((B, D_out), x.dtype),
        grid=grid,
        in_specs=[
            batch_spec(D_in),
            resident(w1.shape), resident(b1.shape),
            resident(w2.shape), resident(b2.shape),
            resident(w3.shape), resident(b3.shape),
        ],
        out_specs=batch_spec(D_out),
        compiler_params=pltpu.CompilerParams(
            # v7x: shard batch tiles across both TensorCores; harmless on v5e/v6e.
            dimension_semantics=("parallel",),
        ),
    )(x, w1, b1, w2, b2, w3, b3)


def reference(x, w1, b1, w2, b2, w3, b3):
    h1 = jnp.maximum(x @ w1 + b1, 0.0)
    h2 = jnp.maximum(h1 @ w2 + b2, 0.0)
    return h2 @ w3 + b3


if __name__ == "__main__":
    # Small shapes consistent with the module: ThreeLayerNet(D_in=32, H1=64, H2=32, D_out=16)
    B, D_in, H1, H2, D_out = 8, 32, 64, 32, 16

    key = jax.random.PRNGKey(0)
    kx, k1, k2, k3, kb1, kb2, kb3 = jax.random.split(key, 7)

    x = jax.random.normal(kx, (B, D_in), dtype=jnp.float32)

    # Deterministic parameter init (PyTorch-style uniform(-1/sqrt(fan_in), 1/sqrt(fan_in))).
    def init_linear(kw, kb, fan_in, fan_out):
        bound = 1.0 / jnp.sqrt(fan_in)
        w = jax.random.uniform(kw, (fan_in, fan_out), jnp.float32, -bound, bound)
        b = jax.random.uniform(kb, (1, fan_out), jnp.float32, -bound, bound)
        return w, b

    w1, b1 = init_linear(k1, kb1, D_in, H1)
    w2, b2 = init_linear(k2, kb2, H1, H2)
    w3, b3 = init_linear(k3, kb3, H2, D_out)

    # f32 matmul path for the demo (keeps 1e-5 tolerance); pass
    # matmul_dtype=jnp.bfloat16 at production shapes for the MXU/bandwidth win.
    y = three_layer_net(x, w1, b1, w2, b2, w3, b3)
    y = jax.block_until_ready(y)

    y_ref = reference(x, w1, b1, w2, b2, w3, b3)
    assert y.shape == (B, D_out)
    assert jnp.allclose(y, y_ref, atol=1e-5, rtol=1e-5)

    print("KERNEL_OK")
</pallas_src>

<mosaic_0001>
module attributes {stable_mosaic.version = 11 : i64} {
  func.func @mlp3_kernel(%arg0: i32, %arg1: memref<8x32xf32, #tpu.memory_space<vmem>>, %arg2: memref<32x64xf32, #tpu.memory_space<vmem>>, %arg3: memref<1x64xf32, #tpu.memory_space<vmem>>, %arg4: memref<64x32xf32, #tpu.memory_space<vmem>>, %arg5: memref<1x32xf32, #tpu.memory_space<vmem>>, %arg6: memref<32x16xf32, #tpu.memory_space<vmem>>, %arg7: memref<1x16xf32, #tpu.memory_space<vmem>>, %arg8: memref<8x16xf32, #tpu.memory_space<vmem>>) attributes {dimension_semantics = [#tpu.dimension_semantics<parallel>], iteration_bounds = array<i64: 1>, scalar_prefetch = 0 : i64, scratch_operands = 0 : i64, tpu.core_type = #tpu.core_type<tc>, window_params = [{transform_indices = @transform_0, window_bounds = array<i64: 8, 32>}, {pipeline_mode = #tpu.pipeline_mode<synchronous>, transform_indices = @transform_1, window_bounds = array<i64: 32, 64>}, {pipeline_mode = #tpu.pipeline_mode<synchronous>, transform_indices = @transform_2, window_bounds = array<i64: 1, 64>}, {pipeline_mode = #tpu.pipeline_mode<synchronous>, transform_indices = @transform_3, window_bounds = array<i64: 64, 32>}, {pipeline_mode = #tpu.pipeline_mode<synchronous>, transform_indices = @transform_4, window_bounds = array<i64: 1, 32>}, {pipeline_mode = #tpu.pipeline_mode<synchronous>, transform_indices = @transform_5, window_bounds = array<i64: 32, 16>}, {pipeline_mode = #tpu.pipeline_mode<synchronous>, transform_indices = @transform_6, window_bounds = array<i64: 1, 16>}, {transform_indices = @transform_7, window_bounds = array<i64: 8, 16>}]} {
    %c0 = arith.constant 0 : index
    %c0_0 = arith.constant 0 : index
    %0 = vector.load %arg1[%c0, %c0_0] : memref<8x32xf32, #tpu.memory_space<vmem>>, vector<8x32xf32>
    %c0_1 = arith.constant 0 : index
    %c0_2 = arith.constant 0 : index
    %1 = vector.load %arg2[%c0_1, %c0_2] : memref<32x64xf32, #tpu.memory_space<vmem>>, vector<32x64xf32>
    %c0_3 = arith.constant 0 : index
    %c0_4 = arith.constant 0 : index
    %2 = vector.load %arg4[%c0_3, %c0_4] : memref<64x32xf32, #tpu.memory_space<vmem>>, vector<64x32xf32>
    %c0_5 = arith.constant 0 : index
    %c0_6 = arith.constant 0 : index
    %3 = vector.load %arg6[%c0_5, %c0_6] : memref<32x16xf32, #tpu.memory_space<vmem>>, vector<32x16xf32>
    %cst = arith.constant dense<0.000000e+00> : vector<8x64xf32>
    %4 = tpu.matmul %0, %1, %cst {dimension_numbers = #tpu.dot_dimension_numbers<[1], [0], [0], [1], [0, 0, 1, 1], [], []>} : vector<8x32xf32>, vector<32x64xf32>, vector<8x64xf32> -> vector<8x64xf32>
    %c0_7 = arith.constant 0 : index
    %c0_8 = arith.constant 0 : index
    %5 = vector.load %arg3[%c0_7, %c0_8] : memref<1x64xf32, #tpu.memory_space<vmem>>, vector<1x64xf32>
    %6 = vector.broadcast %5 : vector<1x64xf32> to vector<8x64xf32>
    %7 = arith.addf %4, %6 : vector<8x64xf32>
    %cst_9 = arith.constant 0.000000e+00 : f32
    %8 = vector.broadcast %cst_9 : f32 to vector<8x64xf32>
    %9 = arith.maximumf %7, %8 : vector<8x64xf32>
    %cst_10 = arith.constant dense<0.000000e+00> : vector<8x32xf32>
    %10 = tpu.matmul %9, %2, %cst_10 {dimension_numbers = #tpu.dot_dimension_numbers<[1], [0], [0], [1], [0, 0, 1, 1], [], []>} : vector<8x64xf32>, vector<64x32xf32>, vector<8x32xf32> -> vector<8x32xf32>
    %c0_11 = arith.constant 0 : index
    %c0_12 = arith.constant 0 : index
    %11 = vector.load %arg5[%c0_11, %c0_12] : memref<1x32xf32, #tpu.memory_space<vmem>>, vector<1x32xf32>
    %12 = vector.broadcast %11 : vector<1x32xf32> to vector<8x32xf32>
    %13 = arith.addf %10, %12 : vector<8x32xf32>
    %cst_13 = arith.constant 0.000000e+00 : f32
    %14 = vector.broadcast %cst_13 : f32 to vector<8x32xf32>
    %15 = arith.maximumf %13, %14 : vector<8x32xf32>
    %cst_14 = arith.constant dense<0.000000e+00> : vector<8x16xf32>
    %16 = tpu.matmul %15, %3, %cst_14 {dimension_numbers = #tpu.dot_dimension_numbers<[1], [0], [0], [1], [0, 0, 1, 1], [], []>} : vector<8x32xf32>, vector<32x16xf32>, vector<8x16xf32> -> vector<8x16xf32>
    %c0_15 = arith.constant 0 : index
    %c0_16 = arith.constant 0 : index
    %17 = vector.load %arg7[%c0_15, %c0_16] : memref<1x16xf32, #tpu.memory_space<vmem>>, vector<1x16xf32>
    %18 = vector.broadcast %17 : vector<1x16xf32> to vector<8x16xf32>
    %19 = arith.addf %16, %18 : vector<8x16xf32>
    %c0_17 = arith.constant 0 : index
    %c0_18 = arith.constant 0 : index
    %20 = vector.load %arg8[%c0_17, %c0_18] : memref<8x16xf32, #tpu.memory_space<vmem>>, vector<8x16xf32>
    tpu.vector_store %arg8[%c0_17, %c0_18], %19 {strides = array<i32>} : memref<8x16xf32, #tpu.memory_space<vmem>>, vector<8x16xf32>,
    return
  }
  func.func @transform_0(%arg0: i32) -> (i32, i32) {
    %c0_i32 = arith.constant 0 : i32
    %c0_i32_0 = arith.constant 0 : i32
    return %arg0, %c0_i32 : i32, i32
  }
  func.func @transform_1(%arg0: i32) -> (i32, i32) {
    %c0_i32 = arith.constant 0 : i32
    %c0_i32_0 = arith.constant 0 : i32
    %c0_i32_1 = arith.constant 0 : i32
    return %c0_i32, %c0_i32_0 : i32, i32
  }
  func.func @transform_2(%arg0: i32) -> (i32, i32) {
    %c0_i32 = arith.constant 0 : i32
    %c0_i32_0 = arith.constant 0 : i32
    %c0_i32_1 = arith.constant 0 : i32
    return %c0_i32, %c0_i32_0 : i32, i32
  }
  func.func @transform_3(%arg0: i32) -> (i32, i32) {
    %c0_i32 = arith.constant 0 : i32
    %c0_i32_0 = arith.constant 0 : i32
    %c0_i32_1 = arith.constant 0 : i32
    return %c0_i32, %c0_i32_0 : i32, i32
  }
  func.func @transform_4(%arg0: i32) -> (i32, i32) {
    %c0_i32 = arith.constant 0 : i32
    %c0_i32_0 = arith.constant 0 : i32
    %c0_i32_1 = arith.constant 0 : i32
    return %c0_i32, %c0_i32_0 : i32, i32
  }
  func.func @transform_5(%arg0: i32) -> (i32, i32) {
    %c0_i32 = arith.constant 0 : i32
    %c0_i32_0 = arith.constant 0 : i32
    %c0_i32_1 = arith.constant 0 : i32
    return %c0_i32, %c0_i32_0 : i32, i32
  }
  func.func @transform_6(%arg0: i32) -> (i32, i32) {
    %c0_i32 = arith.constant 0 : i32
    %c0_i32_0 = arith.constant 0 : i32
    %c0_i32_1 = arith.constant 0 : i32
    return %c0_i32, %c0_i32_0 : i32, i32
  }
  func.func @transform_7(%arg0: i32) -> (i32, i32) {
    %c0_i32 = arith.constant 0 : i32
    %c0_i32_0 = arith.constant 0 : i32
    return %arg0, %c0_i32 : i32, i32
  }
}

</mosaic_0001>

<bundles_post_ra>
// kernel: tpu_custom_call.1
= control target key start
LH: loop header
LB: loop body
LE: loop exit
PB: predicated region body
PF: predicated region fallthrough
CT: control target
= control target key end

     0   :  { %v422_v3 = vmov 0.0|0.0   ;;  %vm423_vm0 = vmmov 0   ;;  %v424_v6 = vmov 0.0   ;;  %s543_s0 = inlined_call_operand.vmem [shape: f32[8,32], index: 0, kind: input, shape index: {}]   ;;  %s544_s1 = inlined_call_operand.vmem [shape: f32[32,64], index: 1, kind: input, shape index: {}]   ;;  %s545_s2 = inlined_call_operand.vmem [shape: f32[1,64], index: 2, kind: input, shape index: {}]   ;;  %s546_s3 = inlined_call_operand.vmem [shape: f32[64,32], index: 3, kind: input, shape index: {}]   ;;  %s547_s4 = inlined_call_operand.vmem [shape: f32[1,32], index: 4, kind: input, shape index: {}]   ;;  %s548_s5 = inlined_call_operand.vmem [shape: f32[32,16], index: 5, kind: input, shape index: {}]   ;;  %s549_s6 = inlined_call_operand.vmem [shape: f32[1,16], index: 6, kind: input, shape index: {}]   ;;  %s550_s7 = inlined_call_operand.hbm [shape: f32[8,16], index: 7, kind: output, shape index: {}]  }
   0x1   :  { %v28_v0 = vld [vmem:[%s544_s1] sm:$0xff]  ;;  %v29_v1 = vld [vmem:[%s544_s1 + $0x8] sm:$0xff]  ;;  %v30_v2 = vld [vmem:[%s544_s1 + $0x10] sm:$0xff]  ;;  %370 = vmatprep.subr.bf16.mxu0 %v422_v3  ;;  %337 = vmatprep.mubr.msk.f32.mxu0 %vm423_vm0, %v424_v6 }
   0x2   :  { %v371_v4 = vpack.c.bf16 %v29_v1, %v28_v0  ;;  %v31_v5 = vld [vmem:[%s544_s1 + $0x18] sm:$0xff]  ;;  %v32_v7 = vld [vmem:[%s546_s3] sm:$0xff]  ;;  %376 = vmatprep.subr.bf16.mxu1 %v422_v3  ;;  %v33_v8 = vld [vmem:[%s546_s3 + $0x8] sm:$0xff]  ;;  %356 = vmatprep.mubr.msk.f32.mxu1 %vm423_vm0, %v424_v6 }
   0x3   :  { %v34_v9 = vld [vmem:[%s546_s3 + $0x10] sm:$0xff]  ;;  %v35_v10 = vld [vmem:[%s546_s3 + $0x18] sm:$0xff]  ;;  %v374_v11 = vpack.c.bf16 %v31_v5, %v30_v2  ;;  %v377_v12 = vpack.c.bf16 %v33_v8, %v32_v7 }
   0x4   :  { %372 = vmatpush3.bf16.msra.mxu0 %v371_v4 }
   0x5   :  { %373 = vmatprep.subr.bf16.mxu0 %v422_v3 }
   0x6   :  { %12 = vsyncpa [#allocation3], 0  ;;  %378 = vmatpush3.bf16.msra.mxu1 %v377_v12  ;;  %v380_v13 = vpack.c.bf16 %v35_v10, %v34_v9  ;;  %v36_v14 = vld [vmem:[%s546_s3 + $0x20] sm:$0xff]  ;;  %v37_v15 = vld [vmem:[%s546_s3 + $0x28] sm:$0xff]  ;;  %vm51_vm1 = vcmask 261120   ;;  %vm133_vm2 = vcmask 523264  }
   0x7   :  { %379 = vmatprep.subr.bf16.mxu1 %v422_v3  ;;  %v27_v16 = vld [vmem:[%s543_s0] sm:$0xff]  ;;  %v383_v17 = vpack.c.bf16 %v37_v15, %v36_v14  ;;  %v38_v18 = vld [vmem:[%s546_s3 + $0x30] sm:$0xff]  ;;  %v39_v19 = vld [vmem:[%s546_s3 + $0x38] sm:$0xff]  ;;  %s425_s14 = smov [#allocation2]   ;;  %vm288_vm3 = vcmask 130048  }
   0x8   :  { %375 = vmatpush3.bf16.msra.mxu0 %v374_v11  ;;  %v386_v20 = vpack.c.bf16 %v39_v19, %v38_v18  ;;  %v40_v21 = vld [vmem:[%s548_s5] sm:$0xff]  ;;  %v41_v22 = vld [vmem:[%s548_s5 + $0x8] sm:$0xff]  ;;  %v42_v29 = vld [vmem:[%s548_s5 + $0x10] sm:$0xff]  ;;  %s296_s15 = sshll.u32 %s425_s14, 4  ;;  %s297_s15 = int_to_ptr.vmem [resolvable:$true] %s296_s15 }
   0x9   :  { %388 = vmatprep.subr.bf16.mxu0 %v422_v3  ;;  %v389_v23 = vpack.c.bf16 %v41_v22, %v40_v21  ;;  %v304_v24 = vld [vmem:[%s545_s2] ss:$0 sm:$0xff]  ;;  %v43_v30 = vld [vmem:[%s548_s5 + $0x18] sm:$0xff]  ;;  %s398_s5 = scalar_lea.vmem %s297_s15, 128  ;;  %p403_p1 = scmp.lt.s32.totalorder %s297_s15, %s297_s15 }
   0xa   :  { %381 = vmatpush3.bf16.msra.mxu1 %v380_v13  ;;  %v392_v31 = vpack.c.bf16 %v43_v30, %v42_v29  ;;  %v306_v32 = vld [vmem:[%s547_s4] ss:$0 sm:$0xff]  ;;  %p399_p0 = scmp.ne.s32.totalorder %s297_s15, %s398_s5  ;;  %p404_p2 = scmp.lt.s32.totalorder %s398_s5, %s398_s5 }
   0xb   :  { %338 = vmatmul.mubr.msk.f32.vlgmr.msra.gmra.mrb[0].mxu0 %vm51_vm1, %v27_v16  ;;  %382 = vmatprep.subr.bf16.mxu1 %v422_v3  ;;  %v308_v37 = vld [vmem:[%s549_s6] ss:$0 sm:$0xff] }
   0xc   :  { %367 = vmatprep.mubr.msk.f32.mxu0 %vm423_vm0, %v424_v6  ;;  %390 = vmatpush3.bf16.msra.mxu0 %v389_v23  ;;  %p405_p3 = por %p404_p2, %p403_p1 }
   0xd   :  { %391 = vmatprep.subr.bf16.mxu0 %v422_v3 }
   0xe   :  { %384 = vmatpush3.bf16.msra.mxu1 %v383_v17  ;;  %p406_p4 = pnand %p405_p3, %p399_p0 }
   0xf   :  { %385 = vmatprep.subr.bf16.mxu1 %v422_v3 }
  0x10   :  { %393 = vmatpush3.bf16.msra.mxu0 %v392_v31 }
  0x12   :  { %387 = vmatpush3.bf16.msra.mxu1 %v386_v20 }
  0xde   :  { %v121_v25 = vpop.f32.mrb[0].mxu0 }
  0xdf   :  { %v122_v26 = vadd.f32 %v304_v24, %v121_v25  ;;  %v339_v27 = vpop.f32.mrb[1].mxu0 }
  0xe1   :  { %v125_v28 = vmax.f32 %v122_v26, 0.0 }
  0xe3   :  { %357 = vmatmul.mubr.msk.f32.vlgmr.msra.gmra.mrb[0].mxu1 %vm133_vm2, %v125_v28 }
 0x1b6   :  { %v203_v33 = vpop.f32.mrb[0].mxu1 }
 0x1b7   :  { %v204_v34 = vadd.f32 %v306_v32, %v203_v33  ;;  %v358_v35 = vpop.f32.mrb[1].mxu1 }
 0x1b9   :  { %v207_v36 = vmax.f32 %v204_v34, 0.0 }
 0x1bb   :  { %368 = vmatmul.mubr.msk.f32.vlgmr.msra.gmra.mrb[2].mxu0 %vm51_vm1, %v207_v36 }
 0x28e   :  { %v284_v38 = vpop.f32.mrb[2].mxu0 }
 0x28f   :  { %v285_v39 = vadd.f32 %v308_v37, %v284_v38  ;;  %v369_v40 = vpop.f32.mrb[3].mxu0 }
 0x291   :  { %289 = vst.msk [vmem:[#allocation2] sm:$0xff] %vm288_vm3, %v285_v39 }
 0x292   :  { %409 = shalt.err (!%p406_p4)
}
 0x293   :  { %s410_s1 = scalar_lea.hbm %s550_s7, 128 }
 0x294   :  { %p411_p5 = scmp.ne.s32.totalorder %s550_s7, %s410_s1  ;;  %p414_p6 = scmp.lt.u32.totalorder %s410_s1, %s550_s7 }
 0x296   :  { %p416_p7 = pnand %p414_p6, %p411_p5 }
 0x298   :  { %419 = shalt.err (!%p416_p7)
}
 0x299   :  { %299 = dma.vmem_to_hbm [thread:$0]  %s297_s15, 128, %s550_s7, [#allocation3]  }
 0x29a   :  { %420 = dma.done.wait [#allocation3], 128  }
 0x29b   :  { %421 = vsyncadd [#allocation3], 4294967168 }
 0x29c   :  { %303 = vsyncpa [#allocation3], 1 }

</bundles_post_ra>
